<compile_context>
chip_gen: v6e
topology: v6e:2x2x1
jax: 0.10.0
libtpu: 0.0.40
codegen_flags: <defaults>
</compile_context>

<pallas_src>
import jax
import jax.numpy as jnp
from jax.experimental import pallas as pl
from jax.experimental.pallas import tpu as pltpu

BN_EPS = 1e-5


def _round_up(n, m):
    return ((n + m - 1) // m) * m


def _pad2(a, rows, cols):
    return jnp.pad(a, ((0, rows - a.shape[0]), (0, cols - a.shape[1])))


# --------------------------- fused Pallas kernel -----------------------------

def gin_fused_kernel(eps_ref,                                   # SMEM (2,)
                     a_ref, x_ref, oh1_ref, oh2_ref,            # per-graph VMEM
                     w11_ref, b11_ref, w12_ref, b12_ref, s1_ref, t1_ref,
                     w21_ref, b21_ref,
                     wl_ref, bl_ref, wf_ref, bf_ref,            # shared weights
                     o_ref):                                    # per-graph out
    f32, bf16 = jnp.float32, jnp.bfloat16
    a = a_ref[...]            # (n_pad, n_pad) bf16 dense adjacency (dst x src)
    x = x_ref[...]            # (n_pad, f_in)  f32 node features

    # ---- GINConv1: (A@x + (1+eps1)*x) -> Lin -> ReLU -> Lin -> ReLU -> BN ----
    h = (jnp.dot(a, x.astype(bf16), preferred_element_type=f32)
         + (1.0 + eps_ref[0]) * x)
    h = jnp.maximum(
        jnp.dot(h.astype(bf16), w11_ref[...], preferred_element_type=f32)
        + b11_ref[...], 0.0)
    h = jnp.maximum(
        jnp.dot(h.astype(bf16), w12_ref[...], preferred_element_type=f32)
        + b12_ref[...], 0.0)
    h = h * s1_ref[...] + t1_ref[...]

    # ---- GINConv2: (A@h + (1+eps2)*h) -> Lin -> ReLU -> [BN folded in lin1] --
    h = (jnp.dot(a, h.astype(bf16), preferred_element_type=f32)
         + (1.0 + eps_ref[1]) * h)
    h = jnp.maximum(
        jnp.dot(h.astype(bf16), w21_ref[...], preferred_element_type=f32)
        + b21_ref[...], 0.0)

    # ---- lin1 (with BN2 affine folded) + ReLU; dropout(eval) = identity ----
    h = jnp.maximum(
        jnp.dot(h.astype(bf16), wl_ref[...], preferred_element_type=f32)
        + bl_ref[...], 0.0)

    # ---- edge gather via one-hot MXU matmuls, x1*x2, then fc2 ----
    hb = h.astype(bf16)
    g1 = jnp.dot(oh1_ref[...], hb, preferred_element_type=f32)   # h[node_id[0]]
    g2 = jnp.dot(oh2_ref[...], hb, preferred_element_type=f32)   # h[node_id[1]]
    e = (g1 * g2).astype(bf16)
    o_ref[...] = (jnp.dot(e, wf_ref[...], preferred_element_type=f32)
                  + bf_ref[...])


# --------------------------- pallas_call wrapper ------------------------------

def gin_fused(params, eps, A, x, oh_src, oh_dst):
    B, n_pad, _ = A.shape
    f_in = x.shape[-1]
    h_pad = params["lin1_w"].shape[1]
    t_pad = oh_src.shape[1]
    c_pad = params["fc2_w"].shape[1]

    # eps on the scalar (SMEM) path.
    eps_spec = pl.BlockSpec((2,), lambda b: (0,),
                            memory_space=pltpu.MemorySpace.SMEM)

    def per_graph(*trail):
        return pl.BlockSpec((None,) + trail, lambda b: (b,) + (0,) * len(trail))

    def shared(arr):
        return pl.BlockSpec(arr.shape, lambda b: (0,) * arr.ndim)

    weights = (params["c1_w1"], params["c1_b1"], params["c1_w2"], params["c1_b2"],
               params["c1_bns"], params["c1_bnb"],
               params["c2_w1"], params["c2_b1"],
               params["lin1_w"], params["lin1_b"],
               params["fc2_w"], params["fc2_b"])

    in_specs = ([eps_spec,
                 per_graph(n_pad, n_pad), per_graph(n_pad, f_in),
                 per_graph(t_pad, n_pad), per_graph(t_pad, n_pad)]
                + [shared(w) for w in weights])

    flops = 2 * B * (n_pad * n_pad * f_in          # A @ x
                     + n_pad * f_in * h_pad        # conv1 lin1
                     + 2 * n_pad * h_pad * h_pad   # conv1 lin2 + conv2 lin
                     + n_pad * n_pad * h_pad       # A @ h
                     + n_pad * h_pad * h_pad       # lin1
                     + 2 * t_pad * n_pad * h_pad   # one-hot edge gathers
                     + t_pad * h_pad * c_pad)      # fc2
    args = (eps, A, x, oh_src, oh_dst) + weights
    bytes_accessed = (sum(int(a.size) * a.dtype.itemsize for a in args)
                      + B * t_pad * c_pad * 4)

    return pl.pallas_call(
        gin_fused_kernel,
        grid=(B,),
        out_shape=jax.ShapeDtypeStruct((B, t_pad, c_pad), jnp.float32),
        in_specs=in_specs,
        out_specs=pl.BlockSpec((None, t_pad, c_pad), lambda b: (b, 0, 0)),
        compiler_params=pltpu.CompilerParams(
            dimension_semantics=("parallel",)),
        cost_estimate=pl.CostEstimate(flops=flops, transcendentals=0,
                                      bytes_accessed=bytes_accessed),
    )(*args)


# --------------------------- parameter init (deterministic) ------------------

def init_linear(key, fan_in, fan_out):
    """PyTorch nn.Linear default init; weight stored [in, out]."""
    k1, k2 = jax.random.split(key)
    bound = 1.0 / (fan_in ** 0.5)
    w = jax.random.uniform(k1, (fan_in, fan_out), jnp.float32, -bound, bound)
    b = jax.random.uniform(k2, (1, fan_out), jnp.float32, -bound, bound)
    return w, b


def init_bn_eval(hidden):
    """BatchNorm1d at init, eval mode: gamma=1, beta=0, mean=0, var=1 folded."""
    scale = jnp.full((1, hidden), 1.0 / (1.0 + BN_EPS) ** 0.5, jnp.float32)
    bias = jnp.zeros((1, hidden), jnp.float32)
    return scale, bias


def init_gin_params(key, input_size, hidden, class_num):
    """Weights padded only where the lanes need it and pre-cast to bf16."""
    f_pad = _round_up(input_size, 8)      # K dim: no 128-padding needed
    h_pad = _round_up(hidden, 128)
    c_pad = _round_up(class_num, 128)
    keys = jax.random.split(key, 5)
    p = {}
    # gin_conv1 MLP: Linear(in,H) ReLU Linear(H,H) ReLU BN(H); train_eps -> 0
    w, b = init_linear(keys[0], input_size, hidden)
    p["c1_w1"] = _pad2(w, f_pad, h_pad).astype(jnp.bfloat16)
    p["c1_b1"] = _pad2(b, 1, h_pad)
    w, b = init_linear(keys[1], hidden, hidden)
    p["c1_w2"] = _pad2(w, h_pad, h_pad).astype(jnp.bfloat16)
    p["c1_b2"] = _pad2(b, 1, h_pad)
    s, t = init_bn_eval(hidden)
    p["c1_bns"], p["c1_bnb"] = _pad2(s, 1, h_pad), _pad2(t, 1, h_pad)
    p["c1_eps"] = jnp.zeros((), jnp.float32)
    # gin_conv2 MLP: Linear(H,H) ReLU BN(H) -- its BN affine folded into lin1
    w, b = init_linear(keys[2], hidden, hidden)
    p["c2_w1"] = _pad2(w, h_pad, h_pad).astype(jnp.bfloat16)
    p["c2_b1"] = _pad2(b, 1, h_pad)
    s2, t2 = init_bn_eval(hidden)
    p["c2_eps"] = jnp.zeros((), jnp.float32)
    # lin1: Linear(H,H) with BN2 folded:  lin1(z*s2+t2) = z@(s2^T*W) + (t2@W+b)
    wl, bl = init_linear(keys[3], hidden, hidden)
    wl_f = s2[0][:, None] * wl
    bl_f = bl + t2 @ wl
    p["lin1_w"] = _pad2(wl_f, h_pad, h_pad).astype(jnp.bfloat16)
    p["lin1_b"] = _pad2(bl_f, 1, h_pad)
    # fc2: Linear(H, class_num), output lanes zero-padded to 128 (sliced after)
    w, b = init_linear(keys[4], hidden, class_num)
    p["fc2_w"] = _pad2(w, h_pad, c_pad).astype(jnp.bfloat16)
    p["fc2_b"] = _pad2(b, 1, c_pad)
    return p


# --------------------------- graph preprocessing -----------------------------

def build_adjacency(edge_index, num_nodes):
    """Dense adjacency A[i,j] = #edges j->i, built ONCE per static graph."""
    n_pad = _round_up(num_nodes, 8)
    src, dst = edge_index[0], edge_index[1]
    a = jnp.zeros((n_pad, n_pad), jnp.float32).at[dst, src].add(1.0)
    return a.astype(jnp.bfloat16)     # integer counts <= 256 are exact in bf16


def build_edge_onehot(edge_index, train_edge_id, n_pad, t_pad):
    """One-hot row-selector matrices for the training edges (for MXU gather)."""
    node_id = edge_index[:, train_edge_id].astype(jnp.int32)      # (2, T)
    t = node_id.shape[1]
    iota = jnp.arange(n_pad, dtype=jnp.int32)[None, :]
    oh = (node_id[:, :, None] == iota)                            # (2, T, n_pad)
    oh = jnp.pad(oh, ((0, 0), (0, t_pad - t), (0, 0)))             # zero rows
    oh = oh.astype(jnp.bfloat16)
    return oh[0], oh[1]


# --------------------------- forward ------------------------------------------

def gin_forward(params, A, x, oh_src, oh_dst, *, class_num, num_edges):
    """Batched GIN head. A/x/oh_* carry a leading graph/edge-batch axis."""
    f_pad = params["c1_w1"].shape[0]
    n_pad = A.shape[1]
    x_p = jnp.pad(x, ((0, 0), (0, n_pad - x.shape[1]), (0, f_pad - x.shape[2])))
    eps = jnp.stack([params["c1_eps"], params["c2_eps"]]).astype(jnp.float32)
    out = gin_fused(params, eps, A, x_p, oh_src, oh_dst)   # (B, t_pad, c_pad)
    return out[:, :num_edges, :class_num]


# --------------------------- main ---------------------------------------------

if __name__ == "__main__":
    B = 2              # graphs / edge batches (grid axis, 'parallel')
    N = 16             # nodes per graph
    INPUT_SIZE = 32    # node feature dim (= BGNN embedding size)
    HIDDEN = 128       # TGNN hidden (lane-aligned)
    CLASS_NUM = 7
    E = 24             # edges per graph
    T = 6              # training edges selected per graph

    key = jax.random.PRNGKey(0)
    k_p, k_graphs = jax.random.split(key)
    params = init_gin_params(k_p, INPUT_SIZE, HIDDEN, CLASS_NUM)

    n_pad = _round_up(N, 8)
    t_pad = _round_up(max(T, 8), 8)

    # Static graphs: build dense adjacency + one-hot edge selectors ONCE each,
    # outside the jitted forward.
    xs, As, ohs, ohd = [], [], [], []
    for gk in jax.random.split(k_graphs, B):
        k_x, k_e, k_t = jax.random.split(gk, 3)
        x_g = jax.random.normal(k_x, (N, INPUT_SIZE), jnp.float32)
        edge_index = jax.random.randint(k_e, (2, E), 0, N, dtype=jnp.int32)
        train_edge_id = jax.random.permutation(k_t, E)[:T].astype(jnp.int32)
        o1, o2 = build_edge_onehot(edge_index, train_edge_id, n_pad, t_pad)
        xs.append(x_g); As.append(build_adjacency(edge_index, N))
        ohs.append(o1); ohd.append(o2)

    x = jnp.stack(xs)
    A = jnp.stack(As)
    oh_src = jnp.stack(ohs)
    oh_dst = jnp.stack(ohd)

    fwd = jax.jit(gin_forward, static_argnames=("class_num", "num_edges"))
    out = fwd(params, A, x, oh_src, oh_dst, class_num=CLASS_NUM, num_edges=T)
    out = jax.block_until_ready(out)

    assert out.shape == (B, T, CLASS_NUM), out.shape
    assert bool(jnp.all(jnp.isfinite(out)))
    print("KERNEL_OK")
</pallas_src>

<mosaic_0001>
module attributes {stable_mosaic.version = 11 : i64} {
  func.func @gin_fused_kernel(%arg0: i32, %arg1: memref<2xf32, #tpu.memory_space<smem>>, %arg2: memref<1x16x16xbf16, #tpu.memory_space<vmem>>, %arg3: memref<1x16x32xf32, #tpu.memory_space<vmem>>, %arg4: memref<1x8x16xbf16, #tpu.memory_space<vmem>>, %arg5: memref<1x8x16xbf16, #tpu.memory_space<vmem>>, %arg6: memref<32x128xbf16, #tpu.memory_space<vmem>>, %arg7: memref<1x128xf32, #tpu.memory_space<vmem>>, %arg8: memref<128x128xbf16, #tpu.memory_space<vmem>>, %arg9: memref<1x128xf32, #tpu.memory_space<vmem>>, %arg10: memref<1x128xf32, #tpu.memory_space<vmem>>, %arg11: memref<1x128xf32, #tpu.memory_space<vmem>>, %arg12: memref<128x128xbf16, #tpu.memory_space<vmem>>, %arg13: memref<1x128xf32, #tpu.memory_space<vmem>>, %arg14: memref<128x128xbf16, #tpu.memory_space<vmem>>, %arg15: memref<1x128xf32, #tpu.memory_space<vmem>>, %arg16: memref<128x128xbf16, #tpu.memory_space<vmem>>, %arg17: memref<1x128xf32, #tpu.memory_space<vmem>>, %arg18: memref<1x8x128xf32, #tpu.memory_space<vmem>>) attributes {dimension_semantics = [#tpu.dimension_semantics<parallel>], iteration_bounds = array<i64: 2>, scalar_prefetch = 0 : i64, scratch_operands = 0 : i64, tpu.core_type = #tpu.core_type<tc>, window_params = [{transform_indices = @transform_0, window_bounds = array<i64: 2>}, {transform_indices = @transform_1, window_bounds = array<i64: 1, 16, 16>}, {transform_indices = @transform_2, window_bounds = array<i64: 1, 16, 32>}, {transform_indices = @transform_3, window_bounds = array<i64: 1, 8, 16>}, {transform_indices = @transform_4, window_bounds = array<i64: 1, 8, 16>}, {pipeline_mode = #tpu.pipeline_mode<synchronous>, transform_indices = @transform_5, window_bounds = array<i64: 32, 128>}, {pipeline_mode = #tpu.pipeline_mode<synchronous>, transform_indices = @transform_6, window_bounds = array<i64: 1, 128>}, {pipeline_mode = #tpu.pipeline_mode<synchronous>, transform_indices = @transform_7, window_bounds = array<i64: 128, 128>}, {pipeline_mode = #tpu.pipeline_mode<synchronous>, transform_indices = @transform_8, window_bounds = array<i64: 1, 128>}, {pipeline_mode = #tpu.pipeline_mode<synchronous>, transform_indices = @transform_9, window_bounds = array<i64: 1, 128>}, {pipeline_mode = #tpu.pipeline_mode<synchronous>, transform_indices = @transform_10, window_bounds = array<i64: 1, 128>}, {pipeline_mode = #tpu.pipeline_mode<synchronous>, transform_indices = @transform_11, window_bounds = array<i64: 128, 128>}, {pipeline_mode = #tpu.pipeline_mode<synchronous>, transform_indices = @transform_12, window_bounds = array<i64: 1, 128>}, {pipeline_mode = #tpu.pipeline_mode<synchronous>, transform_indices = @transform_13, window_bounds = array<i64: 128, 128>}, {pipeline_mode = #tpu.pipeline_mode<synchronous>, transform_indices = @transform_14, window_bounds = array<i64: 1, 128>}, {pipeline_mode = #tpu.pipeline_mode<synchronous>, transform_indices = @transform_15, window_bounds = array<i64: 128, 128>}, {pipeline_mode = #tpu.pipeline_mode<synchronous>, transform_indices = @transform_16, window_bounds = array<i64: 1, 128>}, {transform_indices = @transform_17, window_bounds = array<i64: 1, 8, 128>}]} {
    %c0 = arith.constant 0 : index
    %c0_0 = arith.constant 0 : index
    %c0_1 = arith.constant 0 : index
    %0 = vector.load %arg2[%c0, %c0_0, %c0_1] : memref<1x16x16xbf16, #tpu.memory_space<vmem>>, vector<1x16x16xbf16>
    %1 = vector.shape_cast %0 : vector<1x16x16xbf16> to vector<16x16xbf16>
    %c0_2 = arith.constant 0 : index
    %c0_3 = arith.constant 0 : index
    %c0_4 = arith.constant 0 : index
    %2 = vector.load %arg3[%c0_2, %c0_3, %c0_4] : memref<1x16x32xf32, #tpu.memory_space<vmem>>, vector<1x16x32xf32>
    %3 = vector.shape_cast %2 : vector<1x16x32xf32> to vector<16x32xf32>
    %4 = arith.truncf %3 : vector<16x32xf32> to vector<16x32xbf16>
    %cst = arith.constant dense<0.000000e+00> : vector<16x32xf32>
    %5 = tpu.matmul %1, %4, %cst {dimension_numbers = #tpu.dot_dimension_numbers<[1], [0], [0], [1], [0, 0, 1, 1], [], []>} : vector<16x16xbf16>, vector<16x32xbf16>, vector<16x32xf32> -> vector<16x32xf32>
    %c0_5 = arith.constant 0 : index
    %6 = memref.load %arg1[%c0_5] : memref<2xf32, #tpu.memory_space<smem>>
    %cst_6 = arith.constant 1.000000e+00 : f32
    %7 = arith.addf %cst_6, %6 : f32
    %8 = vector.broadcast %7 : f32 to vector<16x32xf32>
    %9 = arith.mulf %8, %3 : vector<16x32xf32>
    %10 = arith.addf %5, %9 : vector<16x32xf32>
    %11 = arith.truncf %10 : vector<16x32xf32> to vector<16x32xbf16>
    %c0_7 = arith.constant 0 : index
    %c0_8 = arith.constant 0 : index
    %12 = vector.load %arg6[%c0_7, %c0_8] : memref<32x128xbf16, #tpu.memory_space<vmem>>, vector<32x128xbf16>
    %cst_9 = arith.constant dense<0.000000e+00> : vector<16x128xf32>
    %13 = tpu.matmul %11, %12, %cst_9 {dimension_numbers = #tpu.dot_dimension_numbers<[1], [0], [0], [1], [0, 0, 1, 1], [], []>} : vector<16x32xbf16>, vector<32x128xbf16>, vector<16x128xf32> -> vector<16x128xf32>
    %c0_10 = arith.constant 0 : index
    %c0_11 = arith.constant 0 : index
    %14 = vector.load %arg7[%c0_10, %c0_11] : memref<1x128xf32, #tpu.memory_space<vmem>>, vector<1x128xf32>
    %15 = vector.broadcast %14 : vector<1x128xf32> to vector<16x128xf32>
    %16 = arith.addf %13, %15 : vector<16x128xf32>
    %cst_12 = arith.constant 0.000000e+00 : f32
    %17 = vector.broadcast %cst_12 : f32 to vector<16x128xf32>
    %18 = arith.maximumf %16, %17 : vector<16x128xf32>
    %19 = arith.truncf %18 : vector<16x128xf32> to vector<16x128xbf16>
    %c0_13 = arith.constant 0 : index
    %c0_14 = arith.constant 0 : index
    %20 = vector.load %arg8[%c0_13, %c0_14] : memref<128x128xbf16, #tpu.memory_space<vmem>>, vector<128x128xbf16>
    %cst_15 = arith.constant dense<0.000000e+00> : vector<16x128xf32>
    %21 = tpu.matmul %19, %20, %cst_15 {dimension_numbers = #tpu.dot_dimension_numbers<[1], [0], [0], [1], [0, 0, 1, 1], [], []>} : vector<16x128xbf16>, vector<128x128xbf16>, vector<16x128xf32> -> vector<16x128xf32>
    %c0_16 = arith.constant 0 : index
    %c0_17 = arith.constant 0 : index
    %22 = vector.load %arg9[%c0_16, %c0_17] : memref<1x128xf32, #tpu.memory_space<vmem>>, vector<1x128xf32>
    %23 = vector.broadcast %22 : vector<1x128xf32> to vector<16x128xf32>
    %24 = arith.addf %21, %23 : vector<16x128xf32>
    %cst_18 = arith.constant 0.000000e+00 : f32
    %25 = vector.broadcast %cst_18 : f32 to vector<16x128xf32>
    %26 = arith.maximumf %24, %25 : vector<16x128xf32>
    %c0_19 = arith.constant 0 : index
    %c0_20 = arith.constant 0 : index
    %27 = vector.load %arg10[%c0_19, %c0_20] : memref<1x128xf32, #tpu.memory_space<vmem>>, vector<1x128xf32>
    %28 = vector.broadcast %27 : vector<1x128xf32> to vector<16x128xf32>
    %29 = arith.mulf %26, %28 : vector<16x128xf32>
    %c0_21 = arith.constant 0 : index
    %c0_22 = arith.constant 0 : index
    %30 = vector.load %arg11[%c0_21, %c0_22] : memref<1x128xf32, #tpu.memory_space<vmem>>, vector<1x128xf32>
    %31 = vector.broadcast %30 : vector<1x128xf32> to vector<16x128xf32>
    %32 = arith.addf %29, %31 : vector<16x128xf32>
    %33 = arith.truncf %32 : vector<16x128xf32> to vector<16x128xbf16>
    %cst_23 = arith.constant dense<0.000000e+00> : vector<16x128xf32>
    %34 = tpu.matmul %1, %33, %cst_23 {dimension_numbers = #tpu.dot_dimension_numbers<[1], [0], [0], [1], [0, 0, 1, 1], [], []>} : vector<16x16xbf16>, vector<16x128xbf16>, vector<16x128xf32> -> vector<16x128xf32>
    %c1 = arith.constant 1 : index
    %35 = memref.load %arg1[%c1] : memref<2xf32, #tpu.memory_space<smem>>
    %cst_24 = arith.constant 1.000000e+00 : f32
    %36 = arith.addf %cst_24, %35 : f32
    %37 = vector.broadcast %36 : f32 to vector<16x128xf32>
    %38 = arith.mulf %37, %32 : vector<16x128xf32>
    %39 = arith.addf %34, %38 : vector<16x128xf32>
    %40 = arith.truncf %39 : vector<16x128xf32> to vector<16x128xbf16>
    %c0_25 = arith.constant 0 : index
    %c0_26 = arith.constant 0 : index
    %41 = vector.load %arg12[%c0_25, %c0_26] : memref<128x128xbf16, #tpu.memory_space<vmem>>, vector<128x128xbf16>
    %cst_27 = arith.constant dense<0.000000e+00> : vector<16x128xf32>
    %42 = tpu.matmul %40, %41, %cst_27 {dimension_numbers = #tpu.dot_dimension_numbers<[1], [0], [0], [1], [0, 0, 1, 1], [], []>} : vector<16x128xbf16>, vector<128x128xbf16>, vector<16x128xf32> -> vector<16x128xf32>
    %c0_28 = arith.constant 0 : index
    %c0_29 = arith.constant 0 : index
    %43 = vector.load %arg13[%c0_28, %c0_29] : memref<1x128xf32, #tpu.memory_space<vmem>>, vector<1x128xf32>
    %44 = vector.broadcast %43 : vector<1x128xf32> to vector<16x128xf32>
    %45 = arith.addf %42, %44 : vector<16x128xf32>
    %cst_30 = arith.constant 0.000000e+00 : f32
    %46 = vector.broadcast %cst_30 : f32 to vector<16x128xf32>
    %47 = arith.maximumf %45, %46 : vector<16x128xf32>
    %48 = arith.truncf %47 : vector<16x128xf32> to vector<16x128xbf16>
    %c0_31 = arith.constant 0 : index
    %c0_32 = arith.constant 0 : index
    %49 = vector.load %arg14[%c0_31, %c0_32] : memref<128x128xbf16, #tpu.memory_space<vmem>>, vector<128x128xbf16>
    %cst_33 = arith.constant dense<0.000000e+00> : vector<16x128xf32>
    %50 = tpu.matmul %48, %49, %cst_33 {dimension_numbers = #tpu.dot_dimension_numbers<[1], [0], [0], [1], [0, 0, 1, 1], [], []>} : vector<16x128xbf16>, vector<128x128xbf16>, vector<16x128xf32> -> vector<16x128xf32>
    %c0_34 = arith.constant 0 : index
    %c0_35 = arith.constant 0 : index
    %51 = vector.load %arg15[%c0_34, %c0_35] : memref<1x128xf32, #tpu.memory_space<vmem>>, vector<1x128xf32>
    %52 = vector.broadcast %51 : vector<1x128xf32> to vector<16x128xf32>
    %53 = arith.addf %50, %52 : vector<16x128xf32>
    %cst_36 = arith.constant 0.000000e+00 : f32
    %54 = vector.broadcast %cst_36 : f32 to vector<16x128xf32>
    %55 = arith.maximumf %53, %54 : vector<16x128xf32>
    %56 = arith.truncf %55 : vector<16x128xf32> to vector<16x128xbf16>
    %c0_37 = arith.constant 0 : index
    %c0_38 = arith.constant 0 : index
    %c0_39 = arith.constant 0 : index
    %57 = vector.load %arg4[%c0_37, %c0_38, %c0_39] : memref<1x8x16xbf16, #tpu.memory_space<vmem>>, vector<1x8x16xbf16>
    %58 = vector.shape_cast %57 : vector<1x8x16xbf16> to vector<8x16xbf16>
    %cst_40 = arith.constant dense<0.000000e+00> : vector<8x128xf32>
    %59 = tpu.matmul %58, %56, %cst_40 {dimension_numbers = #tpu.dot_dimension_numbers<[1], [0], [0], [1], [0, 0, 1, 1], [], []>} : vector<8x16xbf16>, vector<16x128xbf16>, vector<8x128xf32> -> vector<8x128xf32>
    %c0_41 = arith.constant 0 : index
    %c0_42 = arith.constant 0 : index
    %c0_43 = arith.constant 0 : index
    %60 = vector.load %arg5[%c0_41, %c0_42, %c0_43] : memref<1x8x16xbf16, #tpu.memory_space<vmem>>, vector<1x8x16xbf16>
    %61 = vector.shape_cast %60 : vector<1x8x16xbf16> to vector<8x16xbf16>
    %cst_44 = arith.constant dense<0.000000e+00> : vector<8x128xf32>
    %62 = tpu.matmul %61, %56, %cst_44 {dimension_numbers = #tpu.dot_dimension_numbers<[1], [0], [0], [1], [0, 0, 1, 1], [], []>} : vector<8x16xbf16>, vector<16x128xbf16>, vector<8x128xf32> -> vector<8x128xf32>
    %63 = arith.mulf %59, %62 : vector<8x128xf32>
    %64 = arith.truncf %63 : vector<8x128xf32> to vector<8x128xbf16>
    %c0_45 = arith.constant 0 : index
    %c0_46 = arith.constant 0 : index
    %65 = vector.load %arg16[%c0_45, %c0_46] : memref<128x128xbf16, #tpu.memory_space<vmem>>, vector<128x128xbf16>
    %cst_47 = arith.constant dense<0.000000e+00> : vector<8x128xf32>
    %66 = tpu.matmul %64, %65, %cst_47 {dimension_numbers = #tpu.dot_dimension_numbers<[1], [0], [0], [1], [0, 0, 1, 1], [], []>} : vector<8x128xbf16>, vector<128x128xbf16>, vector<8x128xf32> -> vector<8x128xf32>
    %c0_48 = arith.constant 0 : index
    %c0_49 = arith.constant 0 : index
    %67 = vector.load %arg17[%c0_48, %c0_49] : memref<1x128xf32, #tpu.memory_space<vmem>>, vector<1x128xf32>
    %68 = vector.broadcast %67 : vector<1x128xf32> to vector<8x128xf32>
    %69 = arith.addf %66, %68 : vector<8x128xf32>
    %c0_50 = arith.constant 0 : index
    %c0_51 = arith.constant 0 : index
    %c0_52 = arith.constant 0 : index
    %70 = vector.load %arg18[%c0_50, %c0_51, %c0_52] : memref<1x8x128xf32, #tpu.memory_space<vmem>>, vector<1x8x128xf32>
    %71 = vector.shape_cast %70 : vector<1x8x128xf32> to vector<8x128xf32>
    %72 = vector.shape_cast %69 : vector<8x128xf32> to vector<1x8x128xf32>
    tpu.vector_store %arg18[%c0_50, %c0_51, %c0_52], %72 {strides = array<i32>} : memref<1x8x128xf32, #tpu.memory_space<vmem>>, vector<1x8x128xf32>,
    return
  }
  func.func @transform_0(%arg0: i32) -> i32 {
    %c0_i32 = arith.constant 0 : i32
    %c0_i32_0 = arith.constant 0 : i32
    return %c0_i32 : i32
  }
  func.func @transform_1(%arg0: i32) -> (i32, i32, i32) {
    %c0_i32 = arith.constant 0 : i32
    %c0_i32_0 = arith.constant 0 : i32
    %c0_i32_1 = arith.constant 0 : i32
    return %arg0, %c0_i32, %c0_i32_0 : i32, i32, i32
  }
  func.func @transform_2(%arg0: i32) -> (i32, i32, i32) {
    %c0_i32 = arith.constant 0 : i32
    %c0_i32_0 = arith.constant 0 : i32
    %c0_i32_1 = arith.constant 0 : i32
    return %arg0, %c0_i32, %c0_i32_0 : i32, i32, i32
  }
  func.func @transform_3(%arg0: i32) -> (i32, i32, i32) {
    %c0_i32 = arith.constant 0 : i32
    %c0_i32_0 = arith.constant 0 : i32
    %c0_i32_1 = arith.constant 0 : i32
    return %arg0, %c0_i32, %c0_i32_0 : i32, i32, i32
  }
  func.func @transform_4(%arg0: i32) -> (i32, i32, i32) {
    %c0_i32 = arith.constant 0 : i32
    %c0_i32_0 = arith.constant 0 : i32
    %c0_i32_1 = arith.constant 0 : i32
    return %arg0, %c0_i32, %c0_i32_0 : i32, i32, i32
  }
  func.func @transform_5(%arg0: i32) -> (i32, i32) {
    %c0_i32 = arith.constant 0 : i32
    %c0_i32_0 = arith.constant 0 : i32
    %c0_i32_1 = arith.constant 0 : i32
    return %c0_i32, %c0_i32_0 : i32, i32
  }
  func.func @transform_6(%arg0: i32) -> (i32, i32) {
    %c0_i32 = arith.constant 0 : i32
    %c0_i32_0 = arith.constant 0 : i32
    %c0_i32_1 = arith.constant 0 : i32
    return %c0_i32, %c0_i32_0 : i32, i32
  }
  func.func @transform_7(%arg0: i32) -> (i32, i32) {
    %c0_i32 = arith.constant 0 : i32
    %c0_i32_0 = arith.constant 0 : i32
    %c0_i32_1 = arith.constant 0 : i32
    return %c0_i32, %c0_i32_0 : i32, i32
  }
  func.func @transform_8(%arg0: i32) -> (i32, i32) {
    %c0_i32 = arith.constant 0 : i32
    %c0_i32_0 = arith.constant 0 : i32
    %c0_i32_1 = arith.constant 0 : i32
    return %c0_i32, %c0_i32_0 : i32, i32
  }
  func.func @transform_9(%arg0: i32) -> (i32, i32) {
    %c0_i32 = arith.constant 0 : i32
    %c0_i32_0 = arith.constant 0 : i32
    %c0_i32_1 = arith.constant 0 : i32
    return %c0_i32, %c0_i32_0 : i32, i32
  }
  func.func @transform_10(%arg0: i32) -> (i32, i32) {
    %c0_i32 = arith.constant 0 : i32
    %c0_i32_0 = arith.constant 0 : i32
    %c0_i32_1 = arith.constant 0 : i32
    return %c0_i32, %c0_i32_0 : i32, i32
  }
  func.func @transform_11(%arg0: i32) -> (i32, i32) {
    %c0_i32 = arith.constant 0 : i32
    %c0_i32_0 = arith.constant 0 : i32
    %c0_i32_1 = arith.constant 0 : i32
    return %c0_i32, %c0_i32_0 : i32, i32
  }
  func.func @transform_12(%arg0: i32) -> (i32, i32) {
    %c0_i32 = arith.constant 0 : i32
    %c0_i32_0 = arith.constant 0 : i32
    %c0_i32_1 = arith.constant 0 : i32
    return %c0_i32, %c0_i32_0 : i32, i32
  }
  func.func @transform_13(%arg0: i32) -> (i32, i32) {
    %c0_i32 = arith.constant 0 : i32
    %c0_i32_0 = arith.constant 0 : i32
    %c0_i32_1 = arith.constant 0 : i32
    return %c0_i32, %c0_i32_0 : i32, i32
  }
  func.func @transform_14(%arg0: i32) -> (i32, i32) {
    %c0_i32 = arith.constant 0 : i32
    %c0_i32_0 = arith.constant 0 : i32
    %c0_i32_1 = arith.constant 0 : i32
    return %c0_i32, %c0_i32_0 : i32, i32
  }
  func.func @transform_15(%arg0: i32) -> (i32, i32) {
    %c0_i32 = arith.constant 0 : i32
    %c0_i32_0 = arith.constant 0 : i32
    %c0_i32_1 = arith.constant 0 : i32
    return %c0_i32, %c0_i32_0 : i32, i32
  }
  func.func @transform_16(%arg0: i32) -> (i32, i32) {
    %c0_i32 = arith.constant 0 : i32
    %c0_i32_0 = arith.constant 0 : i32
    %c0_i32_1 = arith.constant 0 : i32
    return %c0_i32, %c0_i32_0 : i32, i32
  }
  func.func @transform_17(%arg0: i32) -> (i32, i32, i32) {
    %c0_i32 = arith.constant 0 : i32
    %c0_i32_0 = arith.constant 0 : i32
    %c0_i32_1 = arith.constant 0 : i32
    return %arg0, %c0_i32, %c0_i32_0 : i32, i32, i32
  }
}

</mosaic_0001>

<bundles_post_ra>
// kernel: gin_forward.1
= control target key start
LH: loop header
LB: loop body
LE: loop exit
PB: predicated region body
PF: predicated region fallthrough
CT: control target
= control target key end

     0   :  { %s3167_s0 = inlined_call_operand.vmem [shape: f32[2], index: 0, kind: input, shape index: {}]   ;;  %s3168_s1 = inlined_call_operand.hbm [shape: bf16[2,16,16], index: 1, kind: input, shape index: {}]   ;;  %s3169_s2 = inlined_call_operand.vmem [shape: f32[2,16,32], index: 2, kind: input, shape index: {}]   ;;  %s3170_s3 = inlined_call_operand.hbm [shape: bf16[2,8,16], index: 3, kind: input, shape index: {}]   ;;  %s3171_s4 = inlined_call_operand.hbm [shape: bf16[2,8,16], index: 4, kind: input, shape index: {}]   ;;  %s3172_s5 = inlined_call_operand.hbm [shape: bf16[32,128], index: 5, kind: input, shape index: {}]   ;;  %s3173_s6 = inlined_call_operand.vmem [shape: f32[1,128], index: 6, kind: input, shape index: {}]   ;;  %s3174_s7 = inlined_call_operand.hbm [shape: bf16[128,128], index: 7, kind: input, shape index: {}]   ;;  %s3175_s8 = inlined_call_operand.vmem [shape: f32[1,128], index: 8, kind: input, shape index: {}]   ;;  %s3176_s9 = inlined_call_operand.hbm [shape: f32[1,128], index: 9, kind: input, shape index: {}]   ;;  %s3177_s10 = inlined_call_operand.hbm [shape: f32[1,128], index: 10, kind: input, shape index: {}]   ;;  %s3178_s11 = inlined_call_operand.hbm [shape: bf16[128,128], index: 11, kind: input, shape index: {}]   ;;  %s3179_s12 = inlined_call_operand.hbm [shape: f32[1,128], index: 12, kind: input, shape index: {}]   ;;  %s3180_s13 = inlined_call_operand.hbm [shape: bf16[128,128], index: 13, kind: input, shape index: {}]   ;;  %s3181_s14 = inlined_call_operand.hbm [shape: f32[1,128], index: 14, kind: input, shape index: {}]   ;;  %s3182_s15 = inlined_call_operand.hbm [shape: bf16[128,128], index: 15, kind: input, shape index: {}]   ;;  %s3183_s16 = inlined_call_operand.hbm [shape: f32[1,128], index: 16, kind: input, shape index: {}]   ;;  %s3184_s17 = inlined_call_operand.vmem [shape: f32[2,8,128], index: 17, kind: output, shape index: {}]  }
   0x1   :  { %3203 = sst [smem:[#allocation35_spill]] %s3167_s0 }
   0x2   :  { %3204 = sst [smem:[#allocation36_spill]] %s3168_s1 }
   0x3   :  { %3205 = sst [smem:[#allocation37_spill]] %s3169_s2 }
   0x4   :  { %3206 = sst [smem:[#allocation38_spill]] %s3170_s3 }
   0x5   :  { %3207 = sst [smem:[#allocation39_spill]] %s3172_s5 }
   0x6   :  { %3208 = sst [smem:[#allocation40_spill]] %s3173_s6 }
   0x7   :  { %3209 = sst [smem:[#allocation41_spill]] %s3175_s8 }
   0x8   :  { %3210 = sst [smem:[#allocation42_spill]] %s3176_s9 }
   0x9   :  { %3211 = sst [smem:[#allocation43_spill]] %s3178_s11 }
   0xa   :  { %3212 = sst [smem:[#allocation44_spill]] %s3180_s13 }
   0xb   :  { %3213 = sst [smem:[#allocation45_spill]] %s3182_s15 }
   0xc   :  { %3214 = sst [smem:[#allocation46_spill]] %s3184_s17 }
   0xd   :  { %22 = vsyncpa [#allocation4], 0 }
   0xe   :  { %23 = vsyncpa [#allocation3], 0 }
   0xf   :  { %25 = vsyncpa [#allocation3 + $0x1], 0 }
  0x10   :  { %26 = vsyncpa [#allocation7], 0 }
  0x11   :  { %28 = vsyncpa [#allocation7 + $0x1], 0 }
  0x12   :  { %29 = vsyncpa [#allocation10], 0 }
  0x13   :  { %30 = vsyncpa [#allocation13], 0 }
  0x14   :  { %31 = vsyncpa [#allocation16], 0 }
  0x15   :  { %32 = vsyncpa [#allocation19], 0 }
  0x16   :  { %33 = vsyncpa [#allocation22], 0  ;;  %s2759_s24 = smov 0   ;;  %s2761_s25 = smov 0  }
  0x17   :  { %s2763_s26 = smov 0   ;;  %s2765_s27 = smov 0  }
  0x18 LB: > { %3215 = sst [smem:[#allocation32_spill]] %s2645_s26  ;;  %s2651_s28 = smov [#allocation9]   ;;  %s2649_s27 = sphi %s2765_s27, %s3256_s27   ;;  %s2645_s26 = sphi %s2763_s26, %s3258_s26   ;;  %s2641_s25 = sphi %s2761_s25, %s3260_s25   ;;  %s2637_s24 = sphi %s2759_s24, %s3259_s24  }
  0x19   : > { %s470_s29 = sshll.u32 %s2651_s28, 4  ;;  %s2780_s0 = sadd.s32 4294967295, %s2649_s27   ;;  %s471_s29 = int_to_ptr.vmem [resolvable:$true] %s470_s29 }
  0x1a   : > { %p1780_p0 = scmp.ge.s32.totalorder %s2649_s27, 1  ;;  %p3191_p1 = scmp.eq.s32.totalorder %s2780_s0, 0 }
  0x1b   : > { %p447_p2 = scmp.lt.s32.totalorder %s2649_s27, 3  ;;  %s2652_s18 = smov [#allocation12]  }
  0x1c   : > { %s503_s19 = sshll.u32 %s2652_s18, 4  ;;  %s2653_s20 = smov [#allocation15]   ;;  %s504_s19 = int_to_ptr.vmem [resolvable:$true] %s503_s19 }
  0x1d   : > { %p2785_p3 = pnand %p1780_p0, %p447_p2  ;;  %s524_s21 = sshll.u32 %s2653_s20, 4  ;;  %s2797_s21 = int_to_ptr.vmem [resolvable:$true] %s524_s21 }
  0x1e   : > { %s2239_s23 = scalar_lea.vmem %s471_s29, 256  ;;  %p2247_p10 = scmp.lt.s32.totalorder %s471_s29, %s471_s29 }
  0x1f   : > { %s3216_s30 = scalar_select %p2785_p3, 1, 0 }
  0x20   : > { %p2079_p4 = pneg %p2785_p3  ;;  %p2240_p7 = scmp.ne.s32.totalorder %s471_s29, %s2239_s23 }
  0x21   : > { %p2248_p11 = scmp.lt.s32.totalorder %s2239_s23, %s2239_s23 }
  0x22   : > { %p2793_p5 = pnand %p2079_p4, %p3191_p1 }
  0x23   : > { %p2249_p12 = por %p2248_p11, %p2247_p10 }
  0x24   : > { %s3217_s1 = scalar_select %p2793_p5, 1, 0 }
  0x25   : > { %p2801_p6 = pneg %p2793_p5 }
  0x27   : > { %s3218_s22 = scalar_select %p2801_p6, 1, 0 }
  0x28   : > { %p2242_p8 = pnand %p2240_p7, %p2801_p6 }
  0x2a   : > { %p2243_p9 = pneg %p2242_p8 }
  0x2c   : > { %p2250_p13 = pnand %p2249_p12, %p2243_p9 }
  0x2e   : > { %2253 = shalt.err (!%p2250_p13)
}
  0x2f   : > { %s3186_s28 = smov 64   ;;  %s3188_s18 = smov 4  }
  0x30   : > { %s3219_s5 = sld [smem:[#allocation39_spill]]  ;;  %s2265_s8 = scalar_lea.vmem %s504_s19, 16 }
  0x31   : > { %p2266_p0 = scmp.ne.s32.totalorder %s504_s19, %s2265_s8  ;;  %s2272_s23 = scalar_lea.vmem %s504_s19, 32 }
  0x32   : > { %p2273_p7 = scmp.lt.s32.totalorder %s504_s19, %s504_s19  ;;  %p2274_p8 = scmp.lt.s32.totalorder %s2272_s23, %s2265_s8 }
  0x33   : > { %p2268_p2 = pnand %p2266_p0, %p2801_p6 }
  0x34   : > { %p2275_p9 = por %p2274_p8, %p2273_p7 }
  0x35   : > { %p2269_p4 = pneg %p2268_p2 }
  0x36   : > { %2085 = dma.hbm_to_vmem [thread:$0]  (!%p2793_p5), %s3219_s5, 256, %s471_s29, [#allocation10], %s3186_s28, %s3186_s28, %s3188_s18  }
  0x37   : > { %p2276_p10 = pnand %p2275_p9, %p2269_p4 }
  0x39   : > { %2279 = shalt.err (!%p2276_p10)
}
  0x3a   : > { %s3220_s9 = sld [smem:[#allocation42_spill]]  ;;  %s2291_s17 = scalar_lea.vmem %s2797_s21, 1024 }
  0x3b   : > { %p2292_p11 = scmp.ne.s32.totalorder %s2797_s21, %s2291_s17  ;;  %p2299_p0 = scmp.lt.s32.totalorder %s2797_s21, %s2797_s21 }
  0x3c   : > { %p2300_p2 = scmp.lt.s32.totalorder %s2291_s17, %s2291_s17 }
  0x3d   : > { %p2294_p12 = pnand %p2292_p11, %p2801_p6 }
  0x3e   : > { %p2301_p4 = por %p2300_p2, %p2299_p0 }
  0x3f   : > { %p2295_p13 = pneg %p2294_p12 }
  0x40   : > { %2091 = dma.hbm_to_vmem [thread:$0]  (!%p2793_p5), %s3220_s9, 16, %s504_s19, [#allocation13]  }
  0x41   : > { %p2302_p7 = pnand %p2301_p4, %p2295_p13 }
  0x43   : > { %2305 = shalt.err (!%p2302_p7)
}
  0x44   : > { %s3221_s11 = sld [smem:[#allocation43_spill]]  ;;  %s2656_s8 = smov [#allocation18]  }
  0x45   : > { %s548_s29 = sshll.u32 %s2656_s8, 4  ;;  %s2657_s19 = smov [#allocation21]   ;;  %s549_s29 = int_to_ptr.vmem [resolvable:$true] %s548_s29 }
  0x46   : > { %s572_s20 = sshll.u32 %s2657_s19, 4  ;;  %s2317_s23 = scalar_lea.vmem %s549_s29, 1024  ;;  %s573_s20 = int_to_ptr.vmem [resolvable:$true] %s572_s20 }
  0x47   : > { %p2318_p8 = scmp.ne.s32.totalorder %s549_s29, %s2317_s23  ;;  %p2325_p11 = scmp.lt.s32.totalorder %s549_s29, %s549_s29 }
  0x48   : > { %p2326_p12 = scmp.lt.s32.totalorder %s2317_s23, %s2317_s23 }
  0x49   : > { %p2320_p9 = pnand %p2318_p8, %p2801_p6 }
  0x4a   : > { %2097 = dma.hbm_to_vmem [thread:$0]  (!%p2793_p5), %s3221_s11, 1024, %s2797_s21, [#allocation16], %s3186_s28, %s3186_s28, %s3188_s18  }
  0x4b   : > { %p2321_p10 = pneg %p2320_p9  ;;  %p2327_p13 = por %p2326_p12, %p2325_p11 }
  0x4d   : > { %p2328_p0 = pnand %p2327_p13, %p2321_p10 }
  0x4f   : > { %2331 = shalt.err (!%p2328_p0)
}
  0x50   : > { %s3222_s13 = sld [smem:[#allocation44_spill]]  ;;  %s2343_s2 = scalar_lea.vmem %s573_s20, 1024 }
  0x51   : > { %p2344_p2 = scmp.ne.s32.totalorder %s573_s20, %s2343_s2  ;;  %p2351_p8 = scmp.lt.s32.totalorder %s573_s20, %s573_s20 }
  0x52   : > { %p2352_p9 = scmp.lt.s32.totalorder %s2343_s2, %s2343_s2 }
  0x53   : > { %p2346_p4 = pnand %p2344_p2, %p2801_p6 }
  0x54   : > { %p2353_p10 = por %p2352_p9, %p2351_p8 }
  0x55   : > { %p2347_p7 = pneg %p2346_p4 }
  0x56   : > { %2103 = dma.hbm_to_vmem [thread:$0]  (!%p2793_p5), %s3222_s13, 1024, %s549_s29, [#allocation19], %s3186_s28, %s3186_s28, %s3188_s18  }
  0x57   : > { %p2354_p11 = pnand %p2353_p10, %p2347_p7 }
  0x59   : > { %2357 = shalt.err (!%p2354_p11)
}
  0x5a   : > { %s3223_s15 = sld [smem:[#allocation45_spill]]  ;;  %s2858_s29 = sadd.s32 1, %s2649_s27  }
  0x5b   : > { %3224 = sst [smem:[#allocation33_spill]] %s2858_s29  ;;  %s64_s19 = ssub.s32 %s2649_s27, %s2858_s29 }
  0x5c   : > { %s67_s23 = sadd.s32 1, %s2645_s26  ;;  %p65_p12 = scmp.eq.s32.totalorder %s64_s19, 0 }
  0x5d   : > { %p74_p13 = scmp.ne.s32.totalorder %s2645_s26, %s2641_s25  ;;  %p75_p0 = scmp.eq.s32.totalorder %s2649_s27, 0 }
  0x5e   : > { %p80_p2 = scmp.ne.s32.totalorder %s2641_s25, %s2637_s24  ;;  %p2134_p8 = scmp.lt.s32.totalorder %s2649_s27, 2 }
  0x5f   : > { %s2869_s21 = scalar_select %p65_p12, %s2645_s26, %s67_s23  }
  0x60   : > { %2109 = dma.hbm_to_vmem [thread:$0]  (!%p2793_p5), %s3223_s15, 1024, %s573_s20, [#allocation22], %s3186_s28, %s3186_s28, %s3188_s18  }
  0x61   : > { %3225 = sst [smem:[#allocation34_spill]] %s2869_s21  ;;  %p76_p4 = por %p75_p0, %p74_p13 }
  0x62   : > { %p2873_p7 = por %p3191_p1, %p80_p2  ;;  %s2879_s20 = sand.u32 1, %s2645_s26  }
  0x63   : > { %s626_s2 = sand.u32 1, %s2649_s27   ;;  %s3190_s6 = sshll.u32 %s2879_s20, 2 }
  0x64   : > { %s3226_s17 = scalar_select %p2873_p7, 1, 0 }
  0x65   : > { %p2883_p9 = pnand %p2134_p8, %p76_p4  ;;  %s1797_s24 = sshll.u32 %s2649_s27, 6 }
  0x66   : > { %s3228_s3 = sld [smem:[#allocation38_spill]]  ;;  %s630_s18 = scalar_lea.vmem [#allocation6], %s3190_s6 }
  0x67   : > { %s3227_s8 = scalar_select %p2883_p9, 1, 0 }
  0x68   : > { %s637_s5 = sshll.u32 %s630_s18, 4  ;;  %s2898_s13 = scalar_lea.hbm %s3171_s4, %s1797_s24  ;;  %s638_s5 = int_to_ptr.vmem [resolvable:$true] %s637_s5 }
  0x69   : > { %s2900_s15 = scalar_lea.sflag [#allocation7], %s626_s2  ;;  %p2906_p11 = pneg %p2883_p9 }
  0x6c   : > { %s2891_s28 = scalar_lea.hbm %s3228_s3, %s1797_s24  ;;  %s2363_s6 = scalar_lea.hbm %s3228_s3, 128 }
  0x6d   : > { %s2358_s21 = scalar_lea.hbm %s2891_s28, 64  ;;  %p2364_p0 = scmp.lt.s32.totalorder %s2891_s28, %s3228_s3 }
  0x6e   : > { %p2359_p10 = scmp.ne.s32.totalorder %s2891_s28, %s2358_s21  ;;  %p2365_p2 = scmp.lt.s32.totalorder %s2363_s6, %s2358_s21 }
  0x70   : > { %p2361_p12 = pnand %p2906_p11, %p2359_p10  ;;  %p2366_p4 = por %p2365_p2, %p2364_p0 }
  0x72   : > { %p2362_p13 = pneg %p2361_p12 }
  0x74   : > { %p2367_p8 = pnand %p2366_p4, %p2362_p13 }
  0x76   : > { %2370 = shalt.err (!%p2367_p8)
}
  0x77   : > { %s2371_s2 = scalar_lea.vmem %s638_s5, 64  ;;  %s2658_s24 = smov [#allocation6]  }
  0x78   : > { %p2372_p1 = scmp.ne.s32.totalorder %s638_s5, %s2371_s2  ;;  %s2376_s26 = sshll.u32 %s2658_s24, 4  ;;  %s2377_s26 = int_to_ptr.vmem [resolvable:$false] %s2376_s26 }
  0x79   : > { %s2378_s29 = scalar_lea.vmem %s2377_s26, 128  ;;  %p2379_p10 = scmp.lt.s32.totalorder %s638_s5, %s2377_s26 }
  0x7a   : > { %p2374_p7 = pnand %p2372_p1, %p2906_p11  ;;  %p2380_p12 = scmp.lt.s32.totalorder %s2378_s29, %s2371_s2 }
  0x7c   : > { %p2375_p3 = pneg %p2374_p7  ;;  %p2381_p5 = por %p2380_p12, %p2379_p10 }
  0x7e   : > { %p2382_p6 = pnand %p2381_p5, %p2375_p3 }
  0x80   : > { %2385 = shalt.err (!%p2382_p6)
}
  0x81   : > { %2119 = dma.hbm_to_vmem [thread:$0]  (!%p2883_p9), %s2891_s28, 64, %s638_s5, %s2900_s15  }
  0x82   : > { %s3230_s18 = sld [smem:[#allocation35_spill]]  ;;  %p3231_p7 = scmp.ne.s32.totalorder %s3218_s22, 0 }
  0x88   : > { %s460_s23 = sshll.u32 %s3230_s18, 4  ;;  %s461_s23 = int_to_ptr.vmem [resolvable:$true] %s460_s23 }
  0x89   : > { %s2386_s9 = scalar_lea.vmem %s461_s23, 16  ;;  %p2394_p2 = scmp.lt.s32.totalorder %s461_s23, %s461_s23 }
  0x8a   : > { %p2387_p1 = scmp.ne.s32.totalorder %s461_s23, %s2386_s9  ;;  %p2395_p4 = scmp.lt.s32.totalorder %s2386_s9, %s2386_s9 }
  0x8c   : > { %p2389_p13 = pnand %p2387_p1, %p3231_p7  ;;  %p2396_p3 = por %p2395_p4, %p2394_p2 }
  0x8e   : > { %p2390_p0 = pneg %p2389_p13 }
  0x90   : > { %p2397_p5 = pnand %p2396_p3, %p2390_p0 }
  0x92   : > { %2400 = shalt.err (!%p2397_p5)
}
  0x93   : > { %s2659_s26 = smov [#allocation2]   ;;  %p3232_p6 = scmp.ne.s32.totalorder %s3217_s1, 0 }
  0x94   : > { %s2660_s5 = smov [#allocation11]   ;;  %s2661_s29 = smov [#allocation14]  }
  0x95   : > { %2082 = dma.vmem_to_smem (!%p3232_p6), %s461_s23, 16, %s2659_s26, [#allocation4]  }
  0x96   : > { %s486_s28 = sshll.u32 %s2660_s5, 4  ;;  %s514_s11 = sshll.u32 %s2661_s29, 4  ;;  %s487_s28 = int_to_ptr.vmem [resolvable:$true] %s486_s28  ;;  %s515_s11 = int_to_ptr.vmem [resolvable:$true] %s514_s11 }
  0x97   : > { %s2412_s2 = scalar_lea.vmem %s487_s28, 1024  ;;  %p2420_p1 = scmp.lt.s32.totalorder %s487_s28, %s487_s28 }
  0x98   : > { %p2413_p8 = scmp.ne.s32.totalorder %s487_s28, %s2412_s2  ;;  %p2421_p13 = scmp.lt.s32.totalorder %s2412_s2, %s2412_s2 }
  0x9a   : > { %p2415_p10 = pnand %p2413_p8, %p3231_p7  ;;  %p2422_p2 = por %p2421_p13, %p2420_p1 }
  0x9c   : > { %p2416_p12 = pneg %p2415_p10 }
  0x9e   : > { %p2423_p0 = pnand %p2422_p2, %p2416_p12 }
  0xa0   : > { %2426 = shalt.err (!%p2423_p0)
}
  0xa1   : > { %s3233_s24 = smov 4   ;;  %s3234_s21 = smov 64  }
  0xa2   : > { %2088 = dma.hbm_to_vmem [thread:$0]  (!%p3232_p6), %s3174_s7, 1024, %s487_s28, [#allocation10], %s3234_s21, %s3234_s21, %s3233_s24  }
  0xa3   : > { %s2438_s23 = scalar_lea.vmem %s515_s11, 16  ;;  %s2445_s9 = scalar_lea.vmem %s515_s11, 32 }
  0xa4   : > { %p2439_p4 = scmp.ne.s32.totalorder %s515_s11, %s2438_s23  ;;  %p2446_p8 = scmp.lt.s32.totalorder %s515_s11, %s515_s11 }
  0xa5   : > { %p2447_p10 = scmp.lt.s32.totalorder %s2445_s9, %s2438_s23 }
  0xa6   : > { %p2441_p3 = pnand %p2439_p4, %p3231_p7 }
  0xa7   : > { %p2448_p12 = por %p2447_p10, %p2446_p8 }
  0xa8   : > { %p2442_p5 = pneg %p2441_p3 }
  0xaa   : > { %p2449_p1 = pnand %p2448_p12, %p2442_p5 }
  0xac   : > { %2452 = shalt.err (!%p2449_p1)
}
  0xad   : > { %2094 = dma.hbm_to_vmem [thread:$0]  (!%p3232_p6), %s3177_s10, 16, %s515_s11, [#allocation13]  }
  0xae   : > { %s2662_s28 = smov [#allocation17]   ;;  %s2663_s2 = smov [#allocation20]  }
  0xaf   : > { %s538_s29 = sshll.u32 %s2662_s28, 4  ;;  %s562_s6 = sshll.u32 %s2663_s2, 4  ;;  %s539_s29 = int_to_ptr.vmem [resolvable:$true] %s538_s29  ;;  %s563_s6 = int_to_ptr.vmem [resolvable:$true] %s562_s6 }
  0xb0   : > { %s2464_s18 = scalar_lea.vmem %s539_s29, 16  ;;  %s2471_s23 = scalar_lea.vmem %s539_s29, 32 }
  0xb1   : > { %p2465_p13 = scmp.ne.s32.totalorder %s539_s29, %s2464_s18  ;;  %p2472_p4 = scmp.lt.s32.totalorder %s539_s29, %s539_s29 }
  0xb2   : > { %p2473_p3 = scmp.lt.s32.totalorder %s2471_s23, %s2464_s18 }
  0xb3   : > { %p2467_p2 = pnand %p2465_p13, %p3231_p7 }
  0xb4   : > { %p2474_p5 = por %p2473_p3, %p2472_p4 }
  0xb5   : > { %p2468_p0 = pneg %p2467_p2 }
  0xb7   : > { %p2475_p8 = pnand %p2474_p5, %p2468_p0 }
  0xb9   : > { %2478 = shalt.err (!%p2475_p8)
}
  0xba   : > { %2100 = dma.hbm_to_vmem [thread:$0]  (!%p3232_p6), %s3179_s12, 16, %s539_s29, [#allocation16]  }
  0xbb   : > { %s2490_s26 = scalar_lea.vmem %s563_s6, 16  ;;  %s2497_s5 = scalar_lea.vmem %s563_s6, 32 }
  0xbc   : > { %p2491_p10 = scmp.ne.s32.totalorder %s563_s6, %s2490_s26  ;;  %p2498_p13 = scmp.lt.s32.totalorder %s563_s6, %s563_s6 }
  0xbd   : > { %p2499_p2 = scmp.lt.s32.totalorder %s2497_s5, %s2490_s26 }
  0xbe   : > { %p2493_p12 = pnand %p2491_p10, %p3231_p7 }
  0xbf   : > { %p2500_p9 = por %p2499_p2, %p2498_p13 }
  0xc0   : > { %p2494_p1 = pneg %p2493_p12 }
  0xc2   : > { %p2501_p4 = pnand %p2500_p9, %p2494_p1 }
  0xc4   : > { %2504 = shalt.err (!%p2501_p4)
}
  0xc5   : > { %2106 = dma.hbm_to_vmem [thread:$0]  (!%p3232_p6), %s3181_s14, 16, %s563_s6, [#allocation19]  }
  0xc6   : > { %s2664_s29 = smov [#allocation23]   ;;  %s1793_s23 = sshll.u32 %s2879_s20, 3 }
  0xc7   : > { %s586_s18 = sshll.u32 %s2664_s29, 4  ;;  %s587_s18 = int_to_ptr.vmem [resolvable:$true] %s586_s18 }
  0xc8   : > { %s2516_s9 = scalar_lea.vmem %s587_s18, 16  ;;  %s2523_s11 = scalar_lea.vmem %s587_s18, 32 }
  0xc9   : > { %p2517_p0 = scmp.ne.s32.totalorder %s587_s18, %s2516_s9  ;;  %p2524_p9 = scmp.lt.s32.totalorder %s587_s18, %s587_s18 }
  0xca   : > { %p2525_p8 = scmp.lt.s32.totalorder %s2523_s11, %s2516_s9 }
  0xcb   : > { %p2519_p3 = pnand %p2517_p0, %p3231_p7 }
  0xcc   : > { %p2526_p10 = por %p2525_p8, %p2524_p9 }
  0xcd   : > { %p2520_p5 = pneg %p2519_p3 }
  0xcf   : > { %p2527_p12 = pnand %p2526_p10, %p2520_p5 }
  0xd1   : > { %2530 = shalt.err (!%p2527_p12)
}
  0xd2   : > { %2112 = dma.hbm_to_vmem [thread:$0]  (!%p3232_p6), %s3183_s16, 16, %s587_s18, [#allocation22]  }
  0xd3   : > { %s1868_s6 = sshll.u32 %s2649_s27, 7  ;;  %s3235_s2 = sld [smem:[#allocation36_spill]] }
  0xd4   : > { %s601_s9 = scalar_lea.vmem [#allocation5], %s1793_s23  ;;  %s3236_s1 = sshll.u32 %s2879_s20, 2 }
  0xd5   : > { %s608_s11 = sshll.u32 %s601_s9, 4  ;;  %s2981_s26 = scalar_lea.vmem [#allocation8], %s3236_s1  ;;  %s2977_s11 = int_to_ptr.vmem [resolvable:$true] %s608_s11 }
  0xd6   : > { %s655_s5 = sshll.u32 %s2981_s26, 4  ;;  %s598_s3 = scalar_lea.sflag [#allocation3], %s2879_s20  ;;  %s656_s5 = int_to_ptr.vmem [resolvable:$true] %s655_s5 }
  0xd9   : > { %s2975_s29 = scalar_lea.hbm %s3235_s2, %s1868_s6  ;;  %s2536_s22 = scalar_lea.hbm %s3235_s2, 256 }
  0xda   : > { %s2531_s18 = scalar_lea.hbm %s2975_s29, 128  ;;  %p2537_p13 = scmp.lt.s32.totalorder %s2975_s29, %s3235_s2 }
  0xdb   : > { %p2532_p7 = scmp.ne.s32.totalorder %s2975_s29, %s2531_s18  ;;  %p2538_p2 = scmp.lt.s32.totalorder %s2536_s22, %s2531_s18 }
  0xdd   : > { %p2534_p6 = pnand %p2532_p7, %p2906_p11  ;;  %p2539_p4 = por %p2538_p2, %p2537_p13 }
  0xdf   : > { %p2535_p1 = pneg %p2534_p6 }
  0xe1   : > { %p2540_p0 = pnand %p2539_p4, %p2535_p1 }
  0xe3   : > { %2543 = shalt.err (!%p2540_p0)
}
  0xe4   : > { %s2544_s20 = scalar_lea.vmem %s2977_s11, 128  ;;  %s2665_s9 = smov [#allocation5]  }
  0xe5   : > { %p2545_p3 = scmp.ne.s32.totalorder %s2977_s11, %s2544_s20  ;;  %s2549_s1 = sshll.u32 %s2665_s9, 4  ;;  %s2550_s1 = int_to_ptr.vmem [resolvable:$false] %s2549_s1 }
  0xe6   : > { %s2551_s27 = scalar_lea.vmem %s2550_s1, 256  ;;  %p2552_p8 = scmp.lt.s32.totalorder %s2977_s11, %s2550_s1 }
  0xe7   : > { %p2547_p5 = pnand %p2545_p3, %p2906_p11  ;;  %p2553_p10 = scmp.lt.s32.totalorder %s2551_s27, %s2544_s20 }
  0xe9   : > { %p2548_p9 = pneg %p2547_p5  ;;  %p2554_p12 = por %p2553_p10, %p2552_p8 }
  0xeb   : > { %p2555_p7 = pnand %p2554_p12, %p2548_p9 }
  0xed   : > { %2558 = shalt.err (!%p2555_p7)
}
  0xee   : > { %p3237_p6 = scmp.ne.s32.totalorder %s3227_s8, 0  ;;  %s2559_s18 = scalar_lea.hbm %s2898_s13, 64 }
  0xef   : > { %p2560_p1 = scmp.ne.s32.totalorder %s2898_s13, %s2559_s18  ;;  %s2564_s28 = scalar_lea.hbm %s3171_s4, 128 }
  0xf0   : > { %2116 = dma.hbm_to_vmem [thread:$0]  (!%p3237_p6), %s2975_s29, 128, %s2977_s11, %s598_s3, %s3234_s21, %s3234_s21, %s3233_s24  }
  0xf1   : > { %p2562_p13 = pnand %p2560_p1, %p2906_p11  ;;  %p2565_p4 = scmp.lt.s32.totalorder %s2898_s13, %s3171_s4 }
  0xf2   : > { %p2566_p0 = scmp.lt.s32.totalorder %s2564_s28, %s2559_s18 }
  0xf3   : > { %p2563_p2 = pneg %p2562_p13 }
  0xf4   : > { %p2567_p3 = por %p2566_p0, %p2565_p4 }
  0xf6   : > { %p2568_p5 = pnand %p2567_p3, %p2563_p2 }
  0xf8   : > { %2571 = shalt.err (!%p2568_p5)
}
  0xf9   : > { %s2572_s3 = scalar_lea.vmem %s656_s5, 64  ;;  %s2666_s24 = smov [#allocation8]  }
  0xfa   : > { %p2573_p9 = scmp.ne.s32.totalorder %s656_s5, %s2572_s3  ;;  %s2577_s21 = sshll.u32 %s2666_s24, 4  ;;  %s2578_s21 = int_to_ptr.vmem [resolvable:$false] %s2577_s21 }
  0xfb   : > { %s2579_s29 = scalar_lea.vmem %s2578_s21, 128  ;;  %p2580_p12 = scmp.lt.s32.totalorder %s656_s5, %s2578_s21 }
  0xfc   : > { %p2575_p8 = pnand %p2573_p9, %p2906_p11  ;;  %p2581_p7 = scmp.lt.s32.totalorder %s2579_s29, %s2572_s3 }
  0xfe   : > { %p2576_p10 = pneg %p2575_p8  ;;  %p2582_p1 = por %p2581_p7, %p2580_p12 }
 0x100   : > { %p2583_p13 = pnand %p2582_p1, %p2576_p10 }
 0x102   : > { %2586 = shalt.err (!%p2583_p13)
}
 0x103   : > { %2122 = dma.hbm_to_vmem [thread:$0]  (!%p3237_p6), %s2898_s13, 64, %s656_s5, %s2900_s15  }
 0x104   : > { %p3238_p2 = scmp.ne.s32.totalorder %s3216_s30, 0 }
 0x105   : > { %p3239_p11 = scmp.eq.s32.totalorder (!%p3238_p2), %s2780_s0, 0 }
 0x106   : > { %664 = sbr.rel (%p3238_p2) target bundleno = 1934 (0x78e), region = 88 }
 0x10b   : > { %2604 = dma.done.wait (%p3239_p11), [#allocation4], 16   ;;  %p3240_p4 = pmov %p3239_p11 }
 0x10c   : > { %s670_s19 = sand.u32 1, %s2641_s25   ;;  %p3241_p0 = scmp.ne.s32.totalorder %s3226_s17, 0 }
 0x10d   : > { %2606 = vsyncadd (%p3240_p4), [#allocation4], 4294967280  ;;  %s1802_s11 = sshll.u32 %s670_s19, 3  ;;  %s671_s26 = scalar_lea.sflag [#allocation3], %s670_s19 }
 0x10e   : > { %s3034_s9 = scalar_lea.vmem [#allocation5], %s1802_s11 }
 0x10f   : > { %2608 = dma.done.wait (%p3241_p0), %s671_s26, 128  }
 0x110   : > { %2610 = vsyncadd (%p3241_p0), %s671_s26, 4294967168  ;;  %s679_s13 = sand.u32 1, %s2780_s0   ;;  %s1803_s15 = sshll.u32 %s670_s19, 2 }
 0x111   : > { %s680_s30 = scalar_lea.sflag [#allocation7], %s679_s13  ;;  %s3041_s8 = scalar_lea.vmem [#allocation6], %s1803_s15 }
 0x112   : > { %2612 = dma.done.wait (%p3241_p0), %s680_s30, 128  }
 0x113   : > { %2614 = vsyncadd (%p3241_p0), %s680_s30, 4294967168  ;;  %s3047_s5 = scalar_lea.vmem [#allocation8], %s1803_s15  ;;  %p3242_p6 = pmov %p3240_p4 }
 0x114   : > { %p3243_p3 = pmov %p3240_p4 }
 0x115   : > { %2616 = dma.done.wait (%p3242_p6), [#allocation10], 1280  }
 0x116   : > { %2618 = vsyncadd (%p3243_p3), [#allocation10], 4294966016  ;;  %p3244_p5 = pmov %p3243_p3 }
 0x117   : > { %p3245_p9 = pmov %p3243_p3 }
 0x118   : > { %2620 = dma.done.wait (%p3244_p5), [#allocation13], 32  }
 0x119   : > { %2622 = vsyncadd (%p3245_p9), [#allocation13], 4294967264  ;;  %p3246_p8 = pmov %p3243_p3 }
 0x11a   : > { %p3247_p10 = pmov %p3243_p3 }
 0x11b   : > { %2624 = dma.done.wait (%p3246_p8), [#allocation16], 1040  }
 0x11c   : > { %2626 = vsyncadd (%p3247_p10), [#allocation16], 4294966256  ;;  %p3248_p12 = pmov %p3243_p3 }
 0x11d   : > { %p3249_p7 = pmov %p3243_p3 }
 0x11e   : > { %2628 = dma.done.wait (%p3248_p12), [#allocation19], 1040  }
 0x11f   : > { %2630 = vsyncadd (%p3249_p7), [#allocation19], 4294966256  ;;  %p3250_p1 = pmov %p3243_p3 }
 0x121   : > { %2632 = dma.done.wait (%p3250_p1), [#allocation22], 1040   ;;  %p3251_p13 = pmov %p3250_p1 }
 0x123   : > { %2634 = vsyncadd (%p3251_p13), [#allocation22], 4294966256 }
 0x124   : > { %737 = sfence }
 0x125   : > { %p798_p2 = scmp.lt.s32.totalorder %s2780_s0, 1  ;;  %v2667_v0 = vmov 0.0   ;;  %vm2668_vm0 = vmmov 0   ;;  %s3252_s18 = sld [smem:[#allocation37_spill]]  ;;  %v3084_v4 = vld [vmem:[%s3034_s9] sm:$0xff]   ;;  %vm823_vm1 = vcmask 130048  }
 0x126   : > { %1917 = vmatprep.subr.bf16.mxu0 %v2667_v0  ;;  %1919 = vmatprep.mubr.msk.bf16.mxu0 %vm2668_vm0, %v2667_v0  ;;  %v2194_v5 = vld [vmem:[#allocation9 + $0x8] sm:$0xff]   ;;  %v2195_v6 = vld [vmem:[#allocation9] sm:$0xff]   ;;  %s813_s22 = sld [smem:[#allocation2]]  ;;  %vm892_vm2 = vcmask 261120   ;;  %v2198_v19 = vld [vmem:[#allocation11 + $0x28] sm:$0xff]  }
 0x127   : > { %s3262_s0 = smov (!%p798_p2, %s2780_s0), 1  ;;  %1951 = vmatprep.subr.bf16.mxu1 %v2667_v0  ;;  %1953 = vmatprep.mubr.msk.bf16.mxu1 %vm2668_vm0, %v2667_v0  ;;  %v2196_v16 = vld [vmem:[#allocation11 + $0x38] sm:$0xff]   ;;  %v2197_v18 = vld [vmem:[#allocation11 + $0x30] sm:$0xff]   ;;  %v2199_v20 = vld [vmem:[#allocation11 + $0x20] sm:$0xff]   ;;  %s3253_s3 = sld [smem:[#allocation40_spill]] }
 0x128   : > { %s1869_s17 = sshll.u32 %s3262_s0, 4  ;;  %v2200_v21 = vld [vmem:[#allocation11 + $0x18] sm:$0xff]   ;;  %v2201_v22 = vld [vmem:[#allocation11 + $0x10] sm:$0xff]   ;;  %v2202_v23 = vld [vmem:[#allocation11 + $0x8] sm:$0xff]   ;;  %s3254_s29 = sld [smem:[#allocation41_spill]] }
 0x129   : > { %v2203_v24 = vld [vmem:[#allocation11] sm:$0xff]   ;;  %v2205_v52 = vld [vmem:[#allocation15 + $0x30] sm:$0xff]   ;;  %v2206_v53 = vld [vmem:[#allocation15 + $0x28] sm:$0xff]   ;;  %s1835_s19 = sld [smem:[#allocation2 + $0x1]]  ;;  %s1817_s26 = sshll.u32 %s3262_s0, 3 }
 0x12a   : > { %v1833_v40 = vld [vmem:[#allocation12] ss:$0 sm:$0xff]  ;;  %v1834_v46 = vld [vmem:[#allocation14] ss:$0 sm:$0xff]  ;;  %v2207_v54 = vld [vmem:[#allocation15 + $0x20] sm:$0xff]   ;;  %s3255_s15 = sld [smem:[#allocation46_spill]] }
 0x12b   : > { %s802_s6 = scalar_lea.vmem %s3252_s18, %s1869_s17  ;;  %v2204_v51 = vld [vmem:[#allocation15 + $0x38] sm:$0xff]   ;;  %v2209_v56 = vld [vmem:[#allocation15 + $0x10] sm:$0xff]   ;;  %v2210_v57 = vld [vmem:[#allocation15 + $0x8] sm:$0xff]  }
 0x12c   : > { %v810_v1 = vld [vmem:[%s802_s6] sm:$0xff]  ;;  %v811_v2 = vld [vmem:[%s802_s6 + $0x8] sm:$0xff]  ;;  %s814_s28 = sadd.f32 1.0, %s813_s22  ;;  %v2211_v58 = vld [vmem:[#allocation15] sm:$0xff]  }
 0x12d   : > { %v812_v3 = vpack.c.bf16 %v811_v2, %v810_v1  ;;  %v1820_v25 = vld [vmem:[%s3253_s3] ss:$0 sm:$0xff]  ;;  %v2208_v55 = vld [vmem:[#allocation15 + $0x18] sm:$0xff]   ;;  %v2215_v62 = vld [vmem:[#allocation18 + $0x20] sm:$0xff]  }
 0x12e   : > { %v815_v7 = vstv %s814_s28  ;;  %v1824_v35 = vld [vmem:[%s3254_s29] ss:$0 sm:$0xff]  ;;  %v2212_v59 = vld [vmem:[#allocation18 + $0x38] sm:$0xff]   ;;  %v2213_v60 = vld [vmem:[#allocation18 + $0x30] sm:$0xff]  }
 0x12f   : > { %1918 = vmatpush3.bf16.msra.mxu0 %v812_v3  ;;  %v816_v9 = vmul.f32 %v815_v7, %v810_v1  ;;  %v817_v10 = vmul.f32 %v815_v7, %v811_v2  ;;  %v2214_v61 = vld [vmem:[#allocation18 + $0x28] sm:$0xff]   ;;  %v2216_v63 = vld [vmem:[#allocation18 + $0x18] sm:$0xff]   ;;  %s1074_s11 = sadd.f32 1.0, %s1835_s19 }
 0x130   : > { %1923 = vmatprep.subr.bf16.mxu0 %v2667_v0  ;;  %s806_s30 = scalar_lea.vmem %s3255_s15, %s1817_s26 }
 0x131   : > { %v1075_v1 = vstv %s1074_s11 }
 0x132   : > { %1920 = vmatmul.mubr.msk.bf16.vlgmr.msra.gmra.mxu0 %vm823_vm1, %v3084_v4 }
 0x133   : > { %1927 = vmatprep.mubr.msk.bf16.mxu0 %vm2668_vm0, %v2667_v0  ;;  %1924 = vmatpush3.bf16.msra.mxu0 %v2194_v5 }
 0x134   : > { %1925 = vmatprep.subr.bf16.mxu0 %v2667_v0 }
 0x137   : > { %1926 = vmatpush3.bf16.msra.mxu0 %v2195_v6 }
 0x138   : > { %1931 = vmatprep.subr.bf16.mxu0 %v2667_v0 }
 0x1f2   : > { %v861_v8 = vpop.f32.mrf.mxu0 }
 0x1f3   : > { %v862_v13 = vadd.f32 %v861_v8, %v816_v9 }
 0x1f4   : > { %v1921_v11 = vpop.f32.mrf.mxu0 }
 0x1f5   : > { %v2217_v11 = vld [vmem:[#allocation18 + $0x10] sm:$0xff]  }
 0x1f6   : > { %v864_v12 = vpop.f32.mrf.mxu0 }
 0x1f7   : > { %v865_v14 = vadd.f32 %v864_v12, %v817_v10  ;;  %v2218_v12 = vld [vmem:[#allocation18 + $0x8] sm:$0xff]  }
 0x1f8   : > { %v1922_v15 = vpop.f32.mrf.mxu0 }
 0x1f9   : > { %v868_v17 = vpack.c.bf16 %v865_v14, %v862_v13  ;;  %v2219_v13 = vld [vmem:[#allocation18] sm:$0xff]   ;;  %v1837_v14 = vld [vmem:[#allocation17] ss:$0 sm:$0xff] }
 0x1fb   : > { %1928 = vmatmul.mubr.msk.bf16.vlgmr.msra.gmra.mxu0 %vm892_vm2, %v868_v17 }
 0x1fc   : > { %1932 = vmatpush3.bf16.msra.mxu0 %v2196_v16  ;;  %1947 = vmatprep.mubr.msk.bf16.mxu0 %vm2668_vm0, %v2667_v0 }
 0x1fd   : > { %1933 = vmatprep.subr.bf16.mxu0 %v2667_v0 }
 0x200   : > { %1934 = vmatpush3.bf16.msra.mxu0 %v2197_v18 }
 0x201   : > { %1935 = vmatprep.subr.bf16.mxu0 %v2667_v0 }
 0x204   : > { %1936 = vmatpush3.bf16.msra.mxu0 %v2198_v19 }
 0x205   : > { %1937 = vmatprep.subr.bf16.mxu0 %v2667_v0 }
 0x208   : > { %1938 = vmatpush3.bf16.msra.mxu0 %v2199_v20 }
 0x209   : > { %1939 = vmatprep.subr.bf16.mxu0 %v2667_v0 }
 0x20c   : > { %1940 = vmatpush3.bf16.msra.mxu0 %v2200_v21 }
 0x20d   : > { %1941 = vmatprep.subr.bf16.mxu0 %v2667_v0 }
 0x210   : > { %1942 = vmatpush3.bf16.msra.mxu0 %v2201_v22 }
 0x211   : > { %1943 = vmatprep.subr.bf16.mxu0 %v2667_v0 }
 0x214   : > { %1944 = vmatpush3.bf16.msra.mxu0 %v2202_v23 }
 0x215   : > { %1945 = vmatprep.subr.bf16.mxu0 %v2667_v0 }
 0x218   : > { %1946 = vmatpush3.bf16.msra.mxu0 %v2203_v24  ;;  %v1846_v24 = vld [vmem:[#allocation20] ss:$0 sm:$0xff] }
 0x219   : > { %1977 = vmatprep.subr.bf16.mxu0 %v2667_v0 }
 0x2bb   : > { %v930_v26 = vpop.f32.mrf.mxu0 }
 0x2bc   : > { %v931_v28 = vadd.f32 %v1820_v25, %v930_v26 }
 0x2bd   : > { %v1929_v27 = vpop.f32.mrf.mxu0 }
 0x2be   : > { %v937_v32 = vmax.f32 %v931_v28, 0.0 }
 0x2bf   : > { %v933_v29 = vpop.f32.mrf.mxu0 }
 0x2c0   : > { %v934_v30 = vadd.f32 %v1820_v25, %v933_v29 }
 0x2c1   : > { %v1930_v31 = vpop.f32.mrf.mxu0 }
 0x2c2   : > { %v938_v33 = vmax.f32 %v934_v30, 0.0 }
 0x2c4   : > { %v939_v34 = vpack.c.bf16 %v938_v33, %v937_v32 }
 0x2c6   : > { %1948 = vmatmul.mubr.bf16.vlgmr.msra.gmra.mxu0 %v939_v34  ;;  %v1350_v34 = vld [vmem:[%s3041_s8] sm:$0xf] }
 0x2c7   : > { %1993 = vmatprep.mubr.msk.bf16.mxu0 %vm2668_vm0, %v2667_v0  ;;  %1978 = vmatpush3.bf16.msra.mxu0 %v2212_v59 }
 0x2c8   : > { %1979 = vmatprep.subr.bf16.mxu0 %v2667_v0 }
 0x2cb   : > { %1980 = vmatpush3.bf16.msra.mxu0 %v2213_v60 }
 0x2cc   : > { %1981 = vmatprep.subr.bf16.mxu0 %v2667_v0 }
 0x2cf   : > { %1982 = vmatpush3.bf16.msra.mxu0 %v2214_v61 }
 0x2d0   : > { %1983 = vmatprep.subr.bf16.mxu0 %v2667_v0 }
 0x2d3   : > { %1984 = vmatpush3.bf16.msra.mxu0 %v2215_v62 }
 0x2d4   : > { %1985 = vmatprep.subr.bf16.mxu0 %v2667_v0 }
 0x2d7   : > { %1986 = vmatpush3.bf16.msra.mxu0 %v2216_v63 }
 0x2d8   : > { %1987 = vmatprep.subr.bf16.mxu0 %v2667_v0 }
 0x2db   : > { %1988 = vmatpush3.bf16.msra.mxu0 %v2217_v11 }
 0x2dc   : > { %1989 = vmatprep.subr.bf16.mxu0 %v2667_v0 }
 0x2df   : > { %1990 = vmatpush3.bf16.msra.mxu0 %v2218_v12 }
 0x2e0   : > { %1991 = vmatprep.subr.bf16.mxu0 %v2667_v0 }
 0x2e3   : > { %1992 = vmatpush3.bf16.msra.mxu0 %v2219_v13 }
 0x386   : > { %v1045_v36 = vpop.f32.mrf.mxu0 }
 0x387   : > { %v1046_v37 = vadd.f32 %v1824_v35, %v1045_v36  ;;  %v2220_v36 = vld [vmem:[#allocation21 + $0x38] sm:$0xff]  }
 0x388   : > { %v1949_v38 = vpop.f32.mrf.mxu0 }
 0x389   : > { %v1052_v39 = vmax.f32 %v1046_v37, 0.0  ;;  %v2221_v37 = vld [vmem:[#allocation21 + $0x30] sm:$0xff]   ;;  %v2222_v38 = vld [vmem:[#allocation21 + $0x28] sm:$0xff]  }
 0x38a   : > { %v1048_v41 = vpop.f32.mrf.mxu0 }
 0x38b   : > { %v1049_v42 = vadd.f32 %v1824_v35, %v1048_v41  ;;  %v1061_v44 = vmul.f32 %v1833_v40, %v1052_v39  ;;  %v1394_v35 = vld [vmem:[%s3047_s5] sm:$0xf]  ;;  %v2225_v41 = vld [vmem:[#allocation21 + $0x10] sm:$0xff]  }
 0x38c   : > { %v1950_v43 = vpop.f32.mrf.mxu0  ;;  %v2223_v39 = vld [vmem:[#allocation21 + $0x20] sm:$0xff]  }
 0x38d   : > { %v1053_v45 = vmax.f32 %v1049_v42, 0.0  ;;  %v1070_v48 = vadd.f32 %v1834_v46, %v1061_v44  ;;  %v2226_v42 = vld [vmem:[#allocation21 + $0x8] sm:$0xff]   ;;  %v2227_v43 = vld [vmem:[#allocation21] sm:$0xff]  }
 0x38f   : > { %v1062_v47 = vmul.f32 %v1833_v40, %v1053_v45  ;;  %v2224_v40 = vld [vmem:[#allocation21 + $0x18] sm:$0xff]  }
 0x391   : > { %v1071_v49 = vadd.f32 %v1834_v46, %v1062_v47 }
 0x393   : > { %v1072_v50 = vpack.c.bf16 %v1071_v49, %v1070_v48  ;;  %v1077_v5 = vmul.f32 %v1075_v1, %v1071_v49 }
 0x395   : > { %1952 = vmatpush3.bf16.msra.mxu1 %v1072_v50 }
 0x396   : > { %1957 = vmatprep.subr.bf16.mxu1 %v2667_v0 }
 0x398   : > { %1954 = vmatmul.mubr.msk.bf16.vlgmr.msra.gmra.mxu1 %vm823_vm1, %v3084_v4  ;;  %v1076_v4 = vmul.f32 %v1075_v1, %v1070_v48 }
 0x399   : > { %1958 = vmatpush3.bf16.msra.mxu1 %v2204_v51  ;;  %1973 = vmatprep.mubr.msk.bf16.mxu1 %vm2668_vm0, %v2667_v0 }
 0x39a   : > { %1959 = vmatprep.subr.bf16.mxu1 %v2667_v0 }
 0x39d   : > { %1960 = vmatpush3.bf16.msra.mxu1 %v2205_v52 }
 0x39e   : > { %1961 = vmatprep.subr.bf16.mxu1 %v2667_v0 }
 0x3a1   : > { %1962 = vmatpush3.bf16.msra.mxu1 %v2206_v53 }
 0x3a2   : > { %1963 = vmatprep.subr.bf16.mxu1 %v2667_v0 }
 0x3a5   : > { %1964 = vmatpush3.bf16.msra.mxu1 %v2207_v54  ;;  %v1857_v54 = vld [vmem:[#allocation23] ss:$0 sm:$0xff] }
 0x3a6   : > { %1965 = vmatprep.subr.bf16.mxu1 %v2667_v0 }
 0x3a9   : > { %1966 = vmatpush3.bf16.msra.mxu1 %v2208_v55 }
 0x3aa   : > { %1967 = vmatprep.subr.bf16.mxu1 %v2667_v0 }
 0x3ad   : > { %1968 = vmatpush3.bf16.msra.mxu1 %v2209_v56 }
 0x3ae   : > { %1969 = vmatprep.subr.bf16.mxu1 %v2667_v0 }
 0x3b1   : > { %1970 = vmatpush3.bf16.msra.mxu1 %v2210_v57 }
 0x3b2   : > { %1971 = vmatprep.subr.bf16.mxu1 %v2667_v0 }
 0x3b5   : > { %1972 = vmatpush3.bf16.msra.mxu1 %v2211_v58 }
 0x3b6   : > { %1997 = vmatprep.subr.bf16.mxu1 %v2667_v0 }
 0x458   : > { %v1112_v2 = vpop.f32.mrf.mxu1 }
 0x459   : > { %v1113_v7 = vadd.f32 %v1112_v2, %v1076_v4 }
 0x45a   : > { %v1955_v3 = vpop.f32.mrf.mxu1 }
 0x45c   : > { %v1115_v6 = vpop.f32.mrf.mxu1 }
 0x45d   : > { %v1116_v8 = vadd.f32 %v1115_v6, %v1077_v5 }
 0x45e   : > { %v1956_v9 = vpop.f32.mrf.mxu1 }
 0x45f   : > { %v1119_v10 = vpack.c.bf16 %v1116_v8, %v1113_v7 }
 0x461   : > { %1974 = vmatmul.mubr.bf16.vlgmr.msra.gmra.mxu1 %v1119_v10 }
 0x462   : > { %1999 = vmatprep.mubr.msk.bf16.mxu1 %vm2668_vm0, %v2667_v0 }
 0x521   : > { %v1225_v15 = vpop.f32.mrf.mxu1 }
 0x522   : > { %v1226_v17 = vadd.f32 %v1837_v14, %v1225_v15 }
 0x523   : > { %v1975_v16 = vpop.f32.mrf.mxu1 }
 0x524   : > { %v1232_v21 = vmax.f32 %v1226_v17, 0.0 }
 0x525   : > { %v1228_v18 = vpop.f32.mrf.mxu1 }
 0x526   : > { %v1229_v19 = vadd.f32 %v1837_v14, %v1228_v18 }
 0x527   : > { %v1976_v20 = vpop.f32.mrf.mxu1 }
 0x528   : > { %v1233_v22 = vmax.f32 %v1229_v19, 0.0 }
 0x52a   : > { %v1234_v23 = vpack.c.bf16 %v1233_v22, %v1232_v21 }
 0x52c   : > { %1994 = vmatmul.mubr.bf16.vlgmr.msra.gmra.mxu0 %v1234_v23 }
 0x5ec   : > { %v1340_v25 = vpop.f32.mrf.mxu0 }
 0x5ed   : > { %v1341_v27 = vadd.f32 %v1846_v24, %v1340_v25 }
 0x5ee   : > { %v1995_v26 = vpop.f32.mrf.mxu0 }
 0x5ef   : > { %v1347_v31 = vmax.f32 %v1341_v27, 0.0 }
 0x5f0   : > { %v1343_v28 = vpop.f32.mrf.mxu0 }
 0x5f1   : > { %v1344_v29 = vadd.f32 %v1846_v24, %v1343_v28 }
 0x5f2   : > { %v1996_v30 = vpop.f32.mrf.mxu0 }
 0x5f3   : > { %v1348_v32 = vmax.f32 %v1344_v29, 0.0 }
 0x5f5   : > { %v1349_v33 = vpack.c.bf16 %v1348_v32, %v1347_v31 }
 0x5f7   : > { %1998 = vmatpush3.bf16.msra.mxu1 %v1349_v33 }
 0x5f8   : > { %2003 = vmatprep.subr.bf16.mxu1 %v2667_v0 }
 0x5fa   : > { %2000 = vmatmul.mubr.msk.bf16.vlgmr.msra.gmra.mxu1 %vm823_vm1, %v1350_v34 }
 0x5fb   : > { %2004 = vmatpush3.bf16.msra.mxu1 %v1349_v33  ;;  %2005 = vmatprep.mubr.msk.bf16.mxu1 %vm2668_vm0, %v2667_v0 }
 0x5fc   : > { %2009 = vmatprep.subr.bf16.mxu1 %v2667_v0 }
 0x602   : > { %2006 = vmatmul.mubr.msk.bf16.vlgmr.msra.gmra.mxu1 %vm823_vm1, %v1394_v35 }
 0x603   : > { %2010 = vmatpush3.bf16.msra.mxu1 %v2220_v36  ;;  %2025 = vmatprep.mubr.msk.bf16.mxu1 %vm2668_vm0, %v2667_v0 }
 0x604   : > { %2011 = vmatprep.subr.bf16.mxu1 %v2667_v0 }
 0x607   : > { %2012 = vmatpush3.bf16.msra.mxu1 %v2221_v37 }
 0x608   : > { %2013 = vmatprep.subr.bf16.mxu1 %v2667_v0 }
 0x60b   : > { %2014 = vmatpush3.bf16.msra.mxu1 %v2222_v38 }
 0x60c   : > { %2015 = vmatprep.subr.bf16.mxu1 %v2667_v0 }
 0x60f   : > { %2016 = vmatpush3.bf16.msra.mxu1 %v2223_v39 }
 0x610   : > { %2017 = vmatprep.subr.bf16.mxu1 %v2667_v0 }
 0x613   : > { %2018 = vmatpush3.bf16.msra.mxu1 %v2224_v40 }
 0x614   : > { %2019 = vmatprep.subr.bf16.mxu1 %v2667_v0 }
 0x617   : > { %2020 = vmatpush3.bf16.msra.mxu1 %v2225_v41 }
 0x618   : > { %2021 = vmatprep.subr.bf16.mxu1 %v2667_v0 }
 0x61b   : > { %2022 = vmatpush3.bf16.msra.mxu1 %v2226_v42 }
 0x61c   : > { %2023 = vmatprep.subr.bf16.mxu1 %v2667_v0 }
 0x61f   : > { %2024 = vmatpush3.bf16.msra.mxu1 %v2227_v43 }
 0x6ba   : > { %v1388_v44 = vpop.f32.mrf.mxu1 }
 0x6bc   : > { %v2001_v45 = vpop.f32.mrf.mxu1 }
 0x6be   : > { %v1391_v46 = vpop.f32.mrf.mxu1 }
 0x6c0   : > { %v2002_v47 = vpop.f32.mrf.mxu1 }
 0x6c2   : > { %v1432_v48 = vpop.f32.mrf.mxu1 }
 0x6c3   : > { %v1438_v49 = vmul.f32 %v1432_v48, %v1388_v44 }
 0x6c4   : > { %v2007_v50 = vpop.f32.mrf.mxu1 }
 0x6c5   : > { %v1439_v51 = vpack.c.bf16 %v1438_v49, %v1438_v49 }
 0x6c6   : > { %v1435_v52 = vpop.f32.mrf.mxu1 }
 0x6c7   : > { %2026 = vmatmul.mubr.bf16.vlgmr.msra.gmra.mxu1 %v1439_v51 }
 0x6c8   : > { %v2008_v53 = vpop.f32.mrf.mxu1 }
 0x787   : > { %v1545_v0 = vpop.f32.mrf.mxu1 }
 0x788   : > { %v1546_v55 = vadd.f32 %v1857_v54, %v1545_v0 }
 0x789   : > { %v2027_v56 = vpop.f32.mrf.mxu1 }
 0x78a   : > { %1551 = vst [vmem:[%s806_s30] sm:$0xff] %v1546_v55 }
 0x78b   : > { %v1548_v57 = vpop.f32.mrf.mxu1 }
 0x78d   : > { %v2028_v58 = vpop.f32.mrf.mxu1 }
 0x78e PF: > { %s3256_s27 = sld [smem:[#allocation33_spill]]  ;;  %s3259_s24 = smov %s2641_s25 }
 0x78f   : > { %s3257_s8 = sld [smem:[#allocation32_spill]] }
 0x790   : > { %s3258_s26 = sld [smem:[#allocation34_spill]] }
 0x794   : > { %p36_p11 = scmp.ge.s32.totalorder %s3256_s27, 4  }
 0x795   : > { %s3260_s25 = smov %s3257_s8 }
 0x796   :  { %38 = sbr.rel (!%p36_p11) target bundleno = 24 (0x18), region = 200 }
 0x79b   :  { %1571 = vsyncpa [#allocation3], 1 }
 0x79c   :  { %1573 = vsyncpa [#allocation3 + $0x1], 1 }
 0x79d   :  { %1574 = vsyncpa [#allocation7], 1 }
 0x79e   :  { %1576 = vsyncpa [#allocation7 + $0x1], 1 }
 0x79f   :  { %1577 = vsyncpa [#allocation10], 1 }
 0x7a0   :  { %1578 = vsyncpa [#allocation13], 1 }
 0x7a1   :  { %1579 = vsyncpa [#allocation16], 1 }
 0x7a2   :  { %1580 = vsyncpa [#allocation19], 1 }
 0x7a3   :  { %1581 = vsyncpa [#allocation22], 1 }
 0x7a4   :  { %1582 = vsyncpa [#allocation4], 1 }
 0x7a5   :  { %1584 = vsyncpa [#allocation4 + $0x1], 1 }

</bundles_post_ra>
